<compile_context>
chip_gen: v5e
topology: v5e:2x2
jax: 0.10.0
libtpu: 0.0.40
codegen_flags: <defaults>
</compile_context>

<pallas_src>
import functools

import numpy as np
import jax
import jax.numpy as jnp
from jax.experimental import pallas as pl
from jax.experimental.pallas import tpu as pltpu

LANE = 128


# ------------------------------ helpers --------------------------------------
def _round_up(x, m):
    return ((x + m - 1) // m) * m


def _device_kind():
    try:
        return jax.devices()[0].device_kind.lower()
    except Exception:
        return ""


def _vmem_budget_bytes(kind):
    if "v7" in kind or "7x" in kind:
        return 40 * 1024 * 1024          # v7x: 64 MiB physical, leave headroom
    if "v6" in kind or "v5" in kind:
        return 96 * 1024 * 1024          # v5e / v6e: 128 MiB physical
    return 32 * 1024 * 1024              # unknown / older: conservative


def _default_tile_prefs(kind):
    if "v7" in kind or "7x" in kind:
        return 512, 1024                 # smaller VMEM, keep 2 dst programs
    return 512, 2048                     # v5e / v6e: plenty of VMEM, mem-bound


def _choose_tiles(n, tm_pref, tk_pref, two_cores):
    """Pad n and pick (tm, tk) multiples of 128 that divide n_pad, never 128-collapsed."""
    if n <= 2 * LANE:
        n_pad = _round_up(max(n, LANE), LANE)
    else:
        n_pad = _round_up(n, 2 * LANE)   # multiple of 256 -> a >=256 divisor always exists

    def pick(pref):
        t = max(min(pref, n_pad) // LANE * LANE, LANE)
        while n_pad % t:
            t -= LANE
        return t

    tm = pick(tm_pref)
    tk = pick(tk_pref)
    if two_cores and n_pad // tm < 2 and n_pad >= 2 * LANE:
        tm = pick(max(n_pad // 2, LANE))  # keep the parallel dst axis >= 2 programs (v7x)
    return n_pad, tm, tk


# ------------------------------ Pallas kernels --------------------------------
def _fused_kernel(a_ref, x_ref, w_ref, b_ref, d_ref, o_ref, *, n_layers):
    """All GCN layers in one kernel; A stays resident in VMEM.

    per layer: x <- relu(d * (A @ (d * (x @ W_l)).astype(A.dtype)) + b_l)
    """
    y_dtype = a_ref.dtype                      # bf16 when A is bf16 (exact adjacency)
    a = a_ref[...]
    d = d_ref[...]                             # (n_pad, 1) f32, d^-1/2
    x = x_ref[...]                             # f32 features
    for layer in range(n_layers):              # static unroll, L is small
        xw = jnp.dot(x, w_ref[layer], preferred_element_type=jnp.float32)
        y = (d * xw).astype(y_dtype)           # src-side normalization folded in
        agg = jnp.dot(a, y, preferred_element_type=jnp.float32)   # bf16 MXU, f32 acc
        x = jnp.maximum(d * agg + b_ref[layer], 0.0)
    o_ref[...] = x.astype(o_ref.dtype)


def _transform_kernel(x_ref, w_ref, d_ref, y_ref):
    """y = d_src^-1/2 * (x @ W), emitted in the aggregation dtype (bf16)."""
    xw = jnp.dot(x_ref[...], w_ref[...], preferred_element_type=jnp.float32)
    y_ref[...] = (d_ref[...] * xw).astype(y_ref.dtype)


def _aggregate_kernel(a_ref, y_ref, d_ref, b_ref, o_ref, acc_ref, *, tk, y_resident):
    """out = relu(d_dst^-1/2 * (A @ y) + b); tiled over (dst, src); src = reduction."""
    k = pl.program_id(1)

    @pl.when(k == 0)
    def _init():
        acc_ref[...] = jnp.zeros_like(acc_ref)

    if y_resident:
        # y is one full-extent VMEM-resident block; slice the current src rows.
        src0 = pl.multiple_of(k * tk, LANE)
        y_blk = y_ref[pl.ds(src0, tk), :]
    else:
        y_blk = y_ref[...]
    # bf16 x bf16 -> f32 accumulate on the MXU (no f32 upcast of the A tile).
    acc_ref[...] += jnp.dot(a_ref[...], y_blk, preferred_element_type=jnp.float32)

    @pl.when(k == pl.num_programs(1) - 1)
    def _finalize():
        out = d_ref[...] * acc_ref[...] + b_ref[...]
        o_ref[...] = jnp.maximum(out, 0.0).astype(o_ref.dtype)


# ------------------------------ kernel wrappers -------------------------------
def fused_forward(a_q, x_p, w_stack, b_stack, d_p, *, vmem_limit):
    n_pad, f = x_p.shape
    n_layers = int(w_stack.shape[0])
    a_bytes = jnp.dtype(a_q.dtype).itemsize
    cost = pl.CostEstimate(
        flops=n_layers * (2 * n_pad * f * f + 2 * n_pad * n_pad * f + 4 * n_pad * f),
        transcendentals=0,
        bytes_accessed=(n_pad * n_pad * a_bytes + 2 * n_pad * f * 4
                        + n_layers * (f * f + f) * 4 + n_pad * 4),
    )
    return pl.pallas_call(
        functools.partial(_fused_kernel, n_layers=n_layers),
        out_shape=jax.ShapeDtypeStruct((n_pad, f), jnp.float32),
        grid_spec=pltpu.PrefetchScalarGridSpec(
            num_scalar_prefetch=0,
            grid=(1,),
            in_specs=[
                pl.BlockSpec((n_pad, n_pad), lambda i: (0, 0)),        # A (resident)
                pl.BlockSpec((n_pad, f), lambda i: (0, 0)),            # x
                pl.BlockSpec((n_layers, f, f), lambda i: (0, 0, 0)),   # W stack
                pl.BlockSpec((n_layers, 1, f), lambda i: (0, 0, 0)),   # b stack
                pl.BlockSpec((n_pad, 1), lambda i: (0, 0)),            # d^-1/2
            ],
            out_specs=pl.BlockSpec((n_pad, f), lambda i: (0, 0)),
        ),
        compiler_params=pltpu.CompilerParams(
            dimension_semantics=("arbitrary",),
            vmem_limit_bytes=vmem_limit,
        ),
        cost_estimate=cost,
    )(a_q, x_p, w_stack, b_stack, d_p)


def feature_transform(x_p, w_p, d_p, y_dtype, *, tm, vmem_limit):
    n_pad, f_in = x_p.shape
    f_out = w_p.shape[1]
    cost = pl.CostEstimate(
        flops=2 * n_pad * f_in * f_out + n_pad * f_out,
        transcendentals=0,
        bytes_accessed=(n_pad * f_in + f_in * f_out + n_pad) * 4
                       + n_pad * f_out * jnp.dtype(y_dtype).itemsize,
    )
    return pl.pallas_call(
        _transform_kernel,
        out_shape=jax.ShapeDtypeStruct((n_pad, f_out), y_dtype),
        grid_spec=pltpu.PrefetchScalarGridSpec(
            num_scalar_prefetch=0,
            grid=(n_pad // tm,),
            in_specs=[
                pl.BlockSpec((tm, f_in), lambda i: (i, 0)),
                pl.BlockSpec((f_in, f_out), lambda i: (0, 0)),
                pl.BlockSpec((tm, 1), lambda i: (i, 0)),
            ],
            out_specs=pl.BlockSpec((tm, f_out), lambda i: (i, 0)),
        ),
        compiler_params=pltpu.CompilerParams(
            dimension_semantics=("parallel",),
            vmem_limit_bytes=vmem_limit,
        ),
        cost_estimate=cost,
    )(x_p, w_p, d_p)


def aggregate(a_q, y_p, d_p, b_p, *, tm, tk, y_resident, vmem_limit):
    n_pad = a_q.shape[0]
    f_out = y_p.shape[1]
    a_bytes = jnp.dtype(a_q.dtype).itemsize
    y_bytes = jnp.dtype(y_p.dtype).itemsize
    y_reads = 1 if y_resident else (n_pad // tm)
    cost = pl.CostEstimate(
        flops=2 * n_pad * n_pad * f_out + 3 * n_pad * f_out,
        transcendentals=0,
        bytes_accessed=(n_pad * n_pad * a_bytes + y_reads * n_pad * f_out * y_bytes
                        + n_pad * f_out * 4 + n_pad * 4 + f_out * 4),
    )
    if y_resident:
        # constant index map -> y is DMA'd once and stays resident across all dst tiles
        y_spec = pl.BlockSpec((n_pad, f_out), lambda i, k: (0, 0))
    else:
        y_spec = pl.BlockSpec((tk, f_out), lambda i, k: (k, 0))
    return pl.pallas_call(
        functools.partial(_aggregate_kernel, tk=tk, y_resident=y_resident),
        out_shape=jax.ShapeDtypeStruct((n_pad, f_out), jnp.float32),
        grid_spec=pltpu.PrefetchScalarGridSpec(
            num_scalar_prefetch=0,
            grid=(n_pad // tm, n_pad // tk),
            in_specs=[
                pl.BlockSpec((tm, tk), lambda i, k: (i, k)),     # A[dst, src] tile (bf16)
                y_spec,                                          # y (src rows), bf16
                pl.BlockSpec((tm, 1), lambda i, k: (i, 0)),      # d^-1/2 (dst rows)
                pl.BlockSpec((1, f_out), lambda i, k: (0, 0)),   # bias
            ],
            out_specs=pl.BlockSpec((tm, f_out), lambda i, k: (i, 0)),
            scratch_shapes=[pltpu.VMEM((tm, f_out), jnp.float32)],
        ),
        compiler_params=pltpu.CompilerParams(
            dimension_semantics=("parallel", "arbitrary"),
            vmem_limit_bytes=vmem_limit,
        ),
        cost_estimate=cost,
    )(a_q, y_p, d_p, b_p)


# ------------------------------ JAX glue --------------------------------------
def build_normalized_graph(edge_index, edge_weight, num_nodes, n_pad, a_dtype):
    """Dense A[dst, src] with add_remaining_self_loops(fill=1), built directly at
    (n_pad, n_pad) and cast once to the kernel dtype; also returns d^-1/2."""
    row, col = edge_index[0], edge_index[1]
    if edge_weight is None:
        edge_weight = jnp.ones((edge_index.shape[1],), jnp.float32)
    a = jnp.zeros((n_pad, n_pad), jnp.float32).at[col, row].add(edge_weight)
    has_self = jnp.zeros((n_pad,), jnp.float32).at[row].add(
        jnp.where(row == col, 1.0, 0.0))
    node_mask = jnp.arange(n_pad) < num_nodes
    a = a + jnp.diag(jnp.where((has_self > 0.0) | ~node_mask, 0.0, 1.0))
    deg = jnp.sum(a, axis=1, keepdims=True)                       # (n_pad, 1)
    d_inv_sqrt = jnp.where(deg > 0.0, jax.lax.rsqrt(deg), 0.0)
    return a.astype(a_dtype), d_inv_sqrt


class HomoGraphPallas:
    """JAX/Pallas re-implementation of homoGraph (GCN path, if_catout=False)."""

    def __init__(self, nhid_list, key):
        self.nhid_list = list(nhid_list)
        self.n_layers = len(nhid_list) - 1
        self.f_pad = max(_round_up(d, LANE) for d in nhid_list)
        self.params = []                 # unpadded (w, b) -- used by the reference
        w_list, b_list = [], []
        for i in range(self.n_layers):
            fin, fout = nhid_list[i], nhid_list[i + 1]
            key, sub = jax.random.split(key)
            stdv = float(np.sqrt(6.0 / (fin + fout)))
            w = jax.random.uniform(sub, (fin, fout), jnp.float32, -stdv, stdv)
            b = jnp.zeros((fout,), jnp.float32)                  # myGCN bias init = 0
            self.params.append((w, b))
            w_list.append(jnp.zeros((self.f_pad, self.f_pad), jnp.float32)
                          .at[:fin, :fout].set(w))
            b_list.append(jnp.zeros((self.f_pad,), jnp.float32).at[:fout].set(b))
        self.w_stack = jnp.stack(w_list)                 # (L, F, F) lane-dense padded
        self.b_stack = jnp.stack(b_list)[:, None, :]     # (L, 1, F)

    def __call__(self, x, homo_edge_index, edge_weight=None, *,
                 force_stream=False, tm_pref=None, tk_pref=None):
        n, fin = x.shape
        f = self.f_pad
        nl = self.n_layers

        kind = _device_kind()
        budget = _vmem_budget_bytes(kind)
        two_cores = ("v7" in kind) or ("7x" in kind)
        tm_d, tk_d = _default_tile_prefs(kind)
        tm_pref = tm_pref or tm_d
        tk_pref = tk_pref or tk_d

        # bf16 A is exact for 0/1 + small-integer duplicate-edge sums; arbitrary
        # float edge_weight falls back to f32 (slower multi-pass MXU, 2x A bytes).
        a_dtype = jnp.bfloat16 if edge_weight is None else jnp.float32
        a_bytes = jnp.dtype(a_dtype).itemsize

        # --- decide fused (A resident across all layers) vs. streamed -----------
        n_pad_min = _round_up(max(n, LANE), LANE)
        fused_bytes = (n_pad_min * n_pad_min * a_bytes
                       + nl * (f * f + f) * 4
                       + 6 * n_pad_min * f * 4 + n_pad_min * 4)
        use_fused = (not force_stream) and fused_bytes <= int(0.4 * budget)

        if use_fused:
            n_pad = n_pad_min
        else:
            n_pad, tm, tk = _choose_tiles(n, tm_pref, tk_pref, two_cores)

        a_q, d_p = build_normalized_graph(homo_edge_index, edge_weight, n, n_pad, a_dtype)
        x_p = jnp.zeros((n_pad, f), jnp.float32).at[:n, :fin].set(x)

        if use_fused:
            out_p = fused_forward(a_q, x_p, self.w_stack, self.b_stack, d_p,
                                  vmem_limit=budget)
        else:
            y_dtype = a_dtype
            y_bytes = jnp.dtype(y_dtype).itemsize
            # keep y resident in VMEM across dst tiles whenever it fits (counting 2x
            # for buffering); otherwise stream (tk, f) blocks per reduction step.
            y_resident = 2 * n_pad * f * y_bytes <= int(0.4 * budget)
            for layer in range(nl):
                y_p = feature_transform(x_p, self.w_stack[layer], d_p, y_dtype,
                                        tm=tm, vmem_limit=budget)
                x_p = aggregate(a_q, y_p, d_p, self.b_stack[layer],
                                tm=tm, tk=tk, y_resident=y_resident,
                                vmem_limit=budget)
            out_p = x_p

        return out_p[:n, : self.nhid_list[-1]]


# ------------------------- pure-JAX f32 reference -----------------------------
def reference_forward(model, x, edge_index, edge_weight=None):
    n = x.shape[0]
    row, col = edge_index[0], edge_index[1]
    ew = jnp.ones((edge_index.shape[1],), jnp.float32) if edge_weight is None else edge_weight
    a = jnp.zeros((n, n), jnp.float32).at[col, row].add(ew)
    self_count = jnp.zeros((n,), jnp.float32).at[row].add(jnp.where(row == col, 1.0, 0.0))
    a = a + jnp.diag(jnp.where(self_count > 0.0, 0.0, 1.0))
    deg = jnp.sum(a, axis=1, keepdims=True)
    dis = jnp.where(deg > 0.0, deg ** -0.5, 0.0)
    a_norm = dis * a * dis.T
    for (w, b) in model.params:
        x = jnp.maximum(a_norm @ (x @ w) + b[None, :], 0.0)
    return x


# ---------------------------------- main ---------------------------------------
if __name__ == "__main__":
    key = jax.random.PRNGKey(0)

    N, E = 16, 40
    nhid_list = [32, 32, 16]              # two myGCN layers: 32 -> 32 -> 16

    key, kx, kr, kc, kp = jax.random.split(key, 5)
    x = jax.random.normal(kx, (N, nhid_list[0]), jnp.float32)
    row = jax.random.randint(kr, (E,), 0, N)
    col = jax.random.randint(kc, (E,), 0, N)
    homo_edge_index = jnp.stack([row, col], axis=0)   # (2, E)

    model = HomoGraphPallas(nhid_list, kp)
    ref = reference_forward(model, x, homo_edge_index)

    # fused path (A resident across layers)
    out_fused = jax.block_until_ready(model(x, homo_edge_index))
    np.testing.assert_allclose(np.asarray(out_fused), np.asarray(ref),
                               rtol=2e-2, atol=2e-2)

    # streaming path (tiled aggregation, resident y), forced for coverage
    out_stream = jax.block_until_ready(model(x, homo_edge_index, force_stream=True))
    np.testing.assert_allclose(np.asarray(out_stream), np.asarray(ref),
                               rtol=2e-2, atol=2e-2)

    assert out_fused.shape == (N, nhid_list[-1])
    print("KERNEL_OK")
</pallas_src>

<mosaic_0001>
module attributes {stable_mosaic.version = 11 : i64} {
  func.func @_fused_kernel(%arg0: i32, %arg1: memref<128x128xbf16, #tpu.memory_space<vmem>>, %arg2: memref<128x128xf32, #tpu.memory_space<vmem>>, %arg3: memref<2x128x128xf32, #tpu.memory_space<vmem>>, %arg4: memref<2x1x128xf32, #tpu.memory_space<vmem>>, %arg5: memref<128x1xf32, #tpu.memory_space<vmem>>, %arg6: memref<128x128xf32, #tpu.memory_space<vmem>>) attributes {dimension_semantics = [#tpu.dimension_semantics<arbitrary>], iteration_bounds = array<i64: 1>, scalar_prefetch = 0 : i64, scratch_operands = 0 : i64, tpu.core_type = #tpu.core_type<tc>, window_params = [{pipeline_mode = #tpu.pipeline_mode<synchronous>, transform_indices = @transform_0, window_bounds = array<i64: 128, 128>}, {pipeline_mode = #tpu.pipeline_mode<synchronous>, transform_indices = @transform_1, window_bounds = array<i64: 128, 128>}, {pipeline_mode = #tpu.pipeline_mode<synchronous>, transform_indices = @transform_2, window_bounds = array<i64: 2, 128, 128>}, {pipeline_mode = #tpu.pipeline_mode<synchronous>, transform_indices = @transform_3, window_bounds = array<i64: 2, 1, 128>}, {pipeline_mode = #tpu.pipeline_mode<synchronous>, transform_indices = @transform_4, window_bounds = array<i64: 128, 1>}, {pipeline_mode = #tpu.pipeline_mode<synchronous>, transform_indices = @transform_5, window_bounds = array<i64: 128, 128>}]} {
    %c0 = arith.constant 0 : index
    %c0_0 = arith.constant 0 : index
    %0 = vector.load %arg1[%c0, %c0_0] : memref<128x128xbf16, #tpu.memory_space<vmem>>, vector<128x128xbf16>
    %c0_1 = arith.constant 0 : index
    %c0_2 = arith.constant 0 : index
    %1 = vector.load %arg5[%c0_1, %c0_2] : memref<128x1xf32, #tpu.memory_space<vmem>>, vector<128x1xf32>
    %c0_3 = arith.constant 0 : index
    %c0_4 = arith.constant 0 : index
    %2 = vector.load %arg2[%c0_3, %c0_4] : memref<128x128xf32, #tpu.memory_space<vmem>>, vector<128x128xf32>
    %c0_5 = arith.constant 0 : index
    %c0_6 = arith.constant 0 : index
    %c0_7 = arith.constant 0 : index
    %3 = vector.load %arg3[%c0_5, %c0_6, %c0_7] : memref<2x128x128xf32, #tpu.memory_space<vmem>>, vector<1x128x128xf32>
    %4 = vector.shape_cast %3 : vector<1x128x128xf32> to vector<128x128xf32>
    %cst = arith.constant dense<0.000000e+00> : vector<128x128xf32>
    %5 = tpu.matmul %2, %4, %cst {dimension_numbers = #tpu.dot_dimension_numbers<[1], [0], [0], [1], [0, 0, 1, 1], [], []>} : vector<128x128xf32>, vector<128x128xf32>, vector<128x128xf32> -> vector<128x128xf32>
    %6 = vector.broadcast %1 : vector<128x1xf32> to vector<128x128xf32>
    %7 = arith.mulf %6, %5 : vector<128x128xf32>
    %8 = arith.truncf %7 : vector<128x128xf32> to vector<128x128xbf16>
    %cst_8 = arith.constant dense<0.000000e+00> : vector<128x128xf32>
    %9 = tpu.matmul %0, %8, %cst_8 {dimension_numbers = #tpu.dot_dimension_numbers<[1], [0], [0], [1], [0, 0, 1, 1], [], []>} : vector<128x128xbf16>, vector<128x128xbf16>, vector<128x128xf32> -> vector<128x128xf32>
    %10 = vector.broadcast %1 : vector<128x1xf32> to vector<128x128xf32>
    %11 = arith.mulf %10, %9 : vector<128x128xf32>
    %c0_9 = arith.constant 0 : index
    %c0_10 = arith.constant 0 : index
    %c0_11 = arith.constant 0 : index
    %12 = vector.load %arg4[%c0_9, %c0_10, %c0_11] : memref<2x1x128xf32, #tpu.memory_space<vmem>>, vector<1x1x128xf32>
    %13 = vector.shape_cast %12 : vector<1x1x128xf32> to vector<1x128xf32>
    %14 = vector.broadcast %13 : vector<1x128xf32> to vector<128x128xf32>
    %15 = arith.addf %11, %14 : vector<128x128xf32>
    %cst_12 = arith.constant 0.000000e+00 : f32
    %16 = vector.broadcast %cst_12 : f32 to vector<128x128xf32>
    %17 = arith.maximumf %15, %16 : vector<128x128xf32>
    %c1 = arith.constant 1 : index
    %c0_13 = arith.constant 0 : index
    %c0_14 = arith.constant 0 : index
    %18 = vector.load %arg3[%c1, %c0_13, %c0_14] : memref<2x128x128xf32, #tpu.memory_space<vmem>>, vector<1x128x128xf32>
    %19 = vector.shape_cast %18 : vector<1x128x128xf32> to vector<128x128xf32>
    %cst_15 = arith.constant dense<0.000000e+00> : vector<128x128xf32>
    %20 = tpu.matmul %17, %19, %cst_15 {dimension_numbers = #tpu.dot_dimension_numbers<[1], [0], [0], [1], [0, 0, 1, 1], [], []>} : vector<128x128xf32>, vector<128x128xf32>, vector<128x128xf32> -> vector<128x128xf32>
    %21 = vector.broadcast %1 : vector<128x1xf32> to vector<128x128xf32>
    %22 = arith.mulf %21, %20 : vector<128x128xf32>
    %23 = arith.truncf %22 : vector<128x128xf32> to vector<128x128xbf16>
    %cst_16 = arith.constant dense<0.000000e+00> : vector<128x128xf32>
    %24 = tpu.matmul %0, %23, %cst_16 {dimension_numbers = #tpu.dot_dimension_numbers<[1], [0], [0], [1], [0, 0, 1, 1], [], []>} : vector<128x128xbf16>, vector<128x128xbf16>, vector<128x128xf32> -> vector<128x128xf32>
    %25 = vector.broadcast %1 : vector<128x1xf32> to vector<128x128xf32>
    %26 = arith.mulf %25, %24 : vector<128x128xf32>
    %c1_17 = arith.constant 1 : index
    %c0_18 = arith.constant 0 : index
    %c0_19 = arith.constant 0 : index
    %27 = vector.load %arg4[%c1_17, %c0_18, %c0_19] : memref<2x1x128xf32, #tpu.memory_space<vmem>>, vector<1x1x128xf32>
    %28 = vector.shape_cast %27 : vector<1x1x128xf32> to vector<1x128xf32>
    %29 = vector.broadcast %28 : vector<1x128xf32> to vector<128x128xf32>
    %30 = arith.addf %26, %29 : vector<128x128xf32>
    %cst_20 = arith.constant 0.000000e+00 : f32
    %31 = vector.broadcast %cst_20 : f32 to vector<128x128xf32>
    %32 = arith.maximumf %30, %31 : vector<128x128xf32>
    %c0_21 = arith.constant 0 : index
    %c0_22 = arith.constant 0 : index
    %33 = vector.load %arg6[%c0_21, %c0_22] : memref<128x128xf32, #tpu.memory_space<vmem>>, vector<128x128xf32>
    tpu.vector_store %arg6[%c0_21, %c0_22], %32 {strides = array<i32>} : memref<128x128xf32, #tpu.memory_space<vmem>>, vector<128x128xf32>,
    return
  }
  func.func @transform_0(%arg0: i32) -> (i32, i32) {
    %c0_i32 = arith.constant 0 : i32
    %c0_i32_0 = arith.constant 0 : i32
    %c0_i32_1 = arith.constant 0 : i32
    return %c0_i32, %c0_i32_0 : i32, i32
  }
  func.func @transform_1(%arg0: i32) -> (i32, i32) {
    %c0_i32 = arith.constant 0 : i32
    %c0_i32_0 = arith.constant 0 : i32
    %c0_i32_1 = arith.constant 0 : i32
    return %c0_i32, %c0_i32_0 : i32, i32
  }
  func.func @transform_2(%arg0: i32) -> (i32, i32, i32) {
    %c0_i32 = arith.constant 0 : i32
    %c0_i32_0 = arith.constant 0 : i32
    %c0_i32_1 = arith.constant 0 : i32
    %c0_i32_2 = arith.constant 0 : i32
    return %c0_i32, %c0_i32_0, %c0_i32_1 : i32, i32, i32
  }
  func.func @transform_3(%arg0: i32) -> (i32, i32, i32) {
    %c0_i32 = arith.constant 0 : i32
    %c0_i32_0 = arith.constant 0 : i32
    %c0_i32_1 = arith.constant 0 : i32
    %c0_i32_2 = arith.constant 0 : i32
    return %c0_i32, %c0_i32_0, %c0_i32_1 : i32, i32, i32
  }
  func.func @transform_4(%arg0: i32) -> (i32, i32) {
    %c0_i32 = arith.constant 0 : i32
    %c0_i32_0 = arith.constant 0 : i32
    %c0_i32_1 = arith.constant 0 : i32
    return %c0_i32, %c0_i32_0 : i32, i32
  }
  func.func @transform_5(%arg0: i32) -> (i32, i32) {
    %c0_i32 = arith.constant 0 : i32
    %c0_i32_0 = arith.constant 0 : i32
    %c0_i32_1 = arith.constant 0 : i32
    return %c0_i32, %c0_i32_0 : i32, i32
  }
}

</mosaic_0001>

<bundles_post_ra>
// kernel: tpu_custom_call.1
= control target key start
LH: loop header
LB: loop body
LE: loop exit
PB: predicated region body
PF: predicated region fallthrough
CT: control target
= control target key end

     0   :  { %10 = vsyncpa [#allocation3], 0  ;;  %s1130_s0 = inlined_call_operand.hbm [shape: bf16[128,128], index: 0, kind: input, shape index: {}]   ;;  %s1131_s1 = inlined_call_operand.vmem [shape: f32[128,128], index: 1, kind: input, shape index: {}]   ;;  %s1132_s2 = inlined_call_operand.hbm [shape: f32[2,128,128], index: 2, kind: input, shape index: {}]   ;;  %s1133_s3 = inlined_call_operand.vmem [shape: f32[2,1,128], index: 3, kind: input, shape index: {}]   ;;  %s1134_s4 = inlined_call_operand.vmem [shape: f32[128,1], index: 4, kind: input, shape index: {}]   ;;  %s1135_s5 = inlined_call_operand.hbm [shape: f32[128,128], index: 5, kind: output, shape index: {}]  }
   0x1   :  { %11 = vsyncpa [#allocation6], 0 }
   0x2   :  { %12 = vsyncpa [#allocation4], 0  ;;  %s17_s20 = sshll.u32 %s1130_s0, 4  ;;  %s811_s21 = smov [#allocation2]   ;;  %s18_s20 = int_to_ptr.hbm [resolvable:$true] %s17_s20 }
   0x3   :  { %s19_s22 = sshll.u32 %s811_s21, 4  ;;  %s32_s25 = sshll.u32 %s1132_s2, 4  ;;  %s20_s22 = int_to_ptr.vmem [resolvable:$true] %s19_s22  ;;  %s33_s25 = int_to_ptr.hbm [resolvable:$true] %s32_s25 }
   0x4   :  { %s812_s26 = smov 64   ;;  %s813_s27 = smov 4  }
   0x5   :  { %25 = dma.hbm_to_vmem [thread:$0]  %s18_s20, 1024, %s20_s22, [#allocation3], %s812_s26, %s812_s26, %s813_s27  }
   0x6   :  { %s814_s28 = smov [#allocation5]   ;;  %s815_s30 = smov 128  }
   0x7   :  { %s34_s29 = sshll.u32 %s814_s28, 4  ;;  %s816_s6 = smov 8   ;;  %s35_s29 = int_to_ptr.vmem [resolvable:$true] %s34_s29 }
   0x8   :  { %40 = dma.hbm_to_vmem [thread:$0]  %s33_s25, 4096, %s35_s29, [#allocation6], %s815_s30, %s815_s30, %s816_s6  }
   0x9   :  { %805 = dma.done.wait [#allocation3], 1024  }
   0xa   :  { %806 = vsyncadd [#allocation3], 4294966272 }
   0xb   :  { %807 = dma.done.wait [#allocation6], 4096  }
   0xc   :  { %808 = vsyncadd [#allocation6], 4294963200  ;;  %v817_v0 = vmov 0   ;;  %v116_v1 = vld [vmem:[#allocation5 + $0x78] sm:$0xff]  ;;  %v115_v2 = vld [vmem:[#allocation5 + $0x70] sm:$0xff] }
   0xd   :  { %728 = vset.pattern.permute.xlu0 %v817_v0  ;;  %730 = vset.pattern.permute.xlu2 %v817_v0  ;;  %v114_v3 = vld [vmem:[#allocation5 + $0x68] sm:$0xff]  ;;  %v83_v4 = vld [vmem:[%s1134_s4 + $0x70] sm:$0xff]  ;;  %v113_v5 = vld [vmem:[#allocation5 + $0x60] sm:$0xff] }
   0xe   :  { %729 = vset.pattern.permute.xlu1 %v817_v0  ;;  %117 = vmatpush.msra.mxu0 %v116_v1  ;;  %v112_v6 = vld [vmem:[#allocation5 + $0x58] sm:$0xff]  ;;  %v81_v7 = vld [vmem:[%s1134_s4 + $0x60] sm:$0xff]  ;;  %v79_v8 = vld [vmem:[%s1134_s4 + $0x50] sm:$0xff] }
   0xf   :  { %254 = vperm.xlu0 %728, %v83_v4   ;;  %244 = vperm.xlu1 %729, %v81_v7   ;;  %v111_v9 = vld [vmem:[#allocation5 + $0x50] sm:$0xff]  ;;  %v84_v10 = vld [vmem:[%s1134_s4 + $0x78] sm:$0xff]  ;;  %v110_v11 = vld [vmem:[#allocation5 + $0x48] sm:$0xff] }
  0x10   :  { %118 = vmatpush.msra.mxu0 %v115_v2  ;;  %234 = vperm.xlu2 %730, %v79_v8   ;;  %v109_v12 = vld [vmem:[#allocation5 + $0x40] sm:$0xff]  ;;  %v82_v13 = vld [vmem:[%s1134_s4 + $0x68] sm:$0xff]  ;;  %v80_v14 = vld [vmem:[%s1134_s4 + $0x58] sm:$0xff] }
  0x11   :  { %v108_v15 = vld [vmem:[#allocation5 + $0x38] sm:$0xff]  ;;  %v107_v16 = vld [vmem:[#allocation5 + $0x30] sm:$0xff]  ;;  %v77_v17 = vld [vmem:[%s1134_s4 + $0x40] sm:$0xff] }
  0x12   :  { %119 = vmatpush.msra.mxu0 %v114_v3  ;;  %v106_v18 = vld [vmem:[#allocation5 + $0x28] sm:$0xff]  ;;  %v105_v19 = vld [vmem:[#allocation5 + $0x20] sm:$0xff]  ;;  %v75_v21 = vld [vmem:[%s1134_s4 + $0x30] sm:$0xff] }
  0x13   :  { %v78_v20 = vld [vmem:[%s1134_s4 + $0x48] sm:$0xff]  ;;  %v104_v22 = vld [vmem:[#allocation5 + $0x18] sm:$0xff]  ;;  %v103_v23 = vld [vmem:[#allocation5 + $0x10] sm:$0xff] }
  0x14   :  { %120 = vmatpush.msra.mxu0 %v113_v5  ;;  %v76_v24 = vld [vmem:[%s1134_s4 + $0x38] sm:$0xff]  ;;  %v102_v25 = vld [vmem:[#allocation5 + $0x8] sm:$0xff]  ;;  %v101_v26 = vld [vmem:[#allocation5] sm:$0xff] }
  0x15   :  { %v73_v27 = vld [vmem:[%s1134_s4 + $0x20] sm:$0xff]  ;;  %v74_v29 = vld [vmem:[%s1134_s4 + $0x28] sm:$0xff]  ;;  %v71_v30 = vld [vmem:[%s1134_s4 + $0x10] sm:$0xff] }
  0x16   :  { %121 = vmatpush.msra.mxu0 %v112_v6  ;;  %v85_v28 = vld [vmem:[%s1131_s1] sm:$0xff]  ;;  %v72_v31 = vld [vmem:[%s1134_s4 + $0x18] sm:$0xff]  ;;  %v86_v32 = vld [vmem:[%s1131_s1 + $0x8] sm:$0xff] }
  0x17   :  { %259 = vperm.xlu0 %728, %v84_v10   ;;  %249 = vperm.xlu1 %729, %v82_v13   ;;  %v69_v33 = vld [vmem:[%s1134_s4] sm:$0xff]  ;;  %v70_v34 = vld [vmem:[%s1134_s4 + $0x8] sm:$0xff]  ;;  %v87_v35 = vld [vmem:[%s1131_s1 + $0x10] sm:$0xff]  ;;  %s665_s4 = sshll.u32 %s1135_s5, 4  ;;  %s666_s4 = int_to_ptr.hbm [resolvable:$true] %s665_s4 }
  0x18   :  { %122 = vmatpush.msra.mxu0 %v111_v9  ;;  %239 = vperm.xlu2 %730, %v80_v14   ;;  %v88_v36 = vld [vmem:[%s1131_s1 + $0x18] sm:$0xff]  ;;  %v89_v37 = vld [vmem:[%s1131_s1 + $0x20] sm:$0xff]  ;;  %v90_v38 = vld [vmem:[%s1131_s1 + $0x28] sm:$0xff] }
  0x19   :  { %v91_v39 = vld [vmem:[%s1131_s1 + $0x30] sm:$0xff]  ;;  %v92_v40 = vld [vmem:[%s1131_s1 + $0x38] sm:$0xff]  ;;  %v93_v41 = vld [vmem:[%s1131_s1 + $0x40] sm:$0xff] }
  0x1a   :  { %123 = vmatpush.msra.mxu0 %v110_v11  ;;  %v94_v42 = vld [vmem:[%s1131_s1 + $0x48] sm:$0xff]  ;;  %v95_v43 = vld [vmem:[%s1131_s1 + $0x50] sm:$0xff]  ;;  %v96_v44 = vld [vmem:[%s1131_s1 + $0x58] sm:$0xff] }
  0x1b   :  { %v97_v47 = vld [vmem:[%s1131_s1 + $0x60] sm:$0xff]  ;;  %v98_v50 = vld [vmem:[%s1131_s1 + $0x68] sm:$0xff]  ;;  %v99_v53 = vld [vmem:[%s1131_s1 + $0x70] sm:$0xff] }
  0x1c   :  { %124 = vmatpush.msra.mxu0 %v109_v12  ;;  %v100_v56 = vld [vmem:[%s1131_s1 + $0x78] sm:$0xff] }
  0x1e   :  { %125 = vmatpush.msra.mxu0 %v108_v15 }
  0x1f   :  { %224 = vperm.xlu0 %728, %v77_v17   ;;  %229 = vperm.xlu1 %729, %v78_v20  }
  0x20   :  { %126 = vmatpush.msra.mxu0 %v107_v16  ;;  %214 = vperm.xlu2 %730, %v75_v21  }
  0x22   :  { %127 = vmatpush.msra.mxu0 %v106_v18 }
  0x24   :  { %128 = vmatpush.msra.mxu0 %v105_v19 }
  0x26   :  { %129 = vmatpush.msra.mxu0 %v104_v22 }
  0x27   :  { %219 = vperm.xlu0 %728, %v76_v24   ;;  %204 = vperm.xlu1 %729, %v73_v27  }
  0x28   :  { %130 = vmatpush.msra.mxu0 %v103_v23  ;;  %209 = vperm.xlu2 %730, %v74_v29  }
  0x2a   :  { %131 = vmatpush.msra.mxu0 %v102_v25 }
  0x2c   :  { %132 = vmatpush.msra.mxu0 %v101_v26 }
  0x2d   :  { %133 = vmatmul.f32.vlgmr.msra.gmra.mxu0 %v85_v28 }
  0x2f   :  { %194 = vperm.xlu0 %728, %v71_v30   ;;  %199 = vperm.xlu1 %729, %v72_v31  }
  0x30   :  { %184 = vperm.xlu2 %730, %v69_v33  }
  0x35   :  { %136 = vmatmul.f32.gmra.mxu0 %v86_v32 }
  0x37   :  { %189 = vperm.xlu0 %728, %v70_v34  }
  0x3d   :  { %139 = vmatmul.f32.gmra.mxu0 %v87_v35 }
  0x45   :  { %142 = vmatmul.f32.gmra.mxu0 %v88_v36 }
  0x4d   :  { %145 = vmatmul.f32.gmra.mxu0 %v89_v37 }
  0x55   :  { %148 = vmatmul.f32.gmra.mxu0 %v90_v38 }
  0x5d   :  { %151 = vmatmul.f32.gmra.mxu0 %v91_v39 }
  0x65   :  { %154 = vmatmul.f32.gmra.mxu0 %v92_v40 }
  0x6a   :  { %v944_v46 = vpop.permute.xlu2 %234 }
  0x6d   :  { %157 = vmatmul.f32.gmra.mxu0 %v93_v41  ;;  %v1002_v41 = vld [vmem:[#allocation2] sm:$0xff] }
  0x72   :  { %v951_v49 = vpop.permute.xlu2 %239 }
  0x75   :  { %160 = vmatmul.f32.gmra.mxu0 %v94_v42  ;;  %v1005_v42 = vld [vmem:[#allocation2 + $0x8] sm:$0xff] }
  0x7a   :  { %v963_v54 = vpop.permute.xlu2 %214 }
  0x7d   :  { %163 = vmatmul.f32.gmra.mxu0 %v95_v43  ;;  %v1008_v43 = vld [vmem:[#allocation2 + $0x10] sm:$0xff] }
  0x81   :  { %v942_v45 = vpop.permute.xlu0 %254  ;;  %v958_v52 = vpop.permute.xlu1 %244 }
  0x82   :  { %v972_v58 = vpop.permute.xlu2 %209 }
  0x85   :  { %166 = vmatmul.f32.gmra.mxu0 %v96_v44  ;;  %v1011_v44 = vld [vmem:[#allocation2 + $0x18] sm:$0xff] }
  0x89   :  { %v949_v48 = vpop.permute.xlu0 %259  ;;  %v970_v57 = vpop.permute.xlu1 %249 }
  0x8a   :  { %v978_v62 = vpop.permute.xlu2 %184 }
  0x8d   :  { %169 = vmatmul.f32.gmra.mxu0 %v97_v47  ;;  %v1014_v47 = vld [vmem:[#allocation2 + $0x20] sm:$0xff] }
  0x91   :  { %v956_v51 = vpop.permute.xlu0 %224  ;;  %v976_v61 = vpop.permute.xlu1 %229 }
  0x95   :  { %172 = vmatmul.f32.gmra.mxu0 %v98_v50  ;;  %v451_v50 = vld [vmem:[#allocation5 + $0xf8] sm:$0xff] }
  0x96   :  { %452 = vmatpush.msra.mxu2 %v451_v50 }
  0x99   :  { %v965_v55 = vpop.permute.xlu0 %219  ;;  %v984_v4 = vpop.permute.xlu1 %204 }
  0x9d   :  { %175 = vmatmul.f32.gmra.mxu0 %v99_v53  ;;  %v450_v53 = vld [vmem:[#allocation5 + $0xf0] sm:$0xff] }
  0x9e   :  { %453 = vmatpush.msra.mxu2 %v450_v53 }
  0xa1   :  { %v974_v59 = vpop.permute.xlu0 %194  ;;  %v986_v6 = vpop.permute.xlu1 %199 }
  0xa5   :  { %178 = vmatmul.f32.gmra.mxu0 %v100_v56  ;;  %v449_v56 = vld [vmem:[#allocation5 + $0xe8] sm:$0xff] }
  0xa6   :  { %454 = vmatpush.msra.mxu2 %v449_v56 }
  0xa9   :  { %v980_v63 = vpop.permute.xlu0 %189 }
  0xaa   :  { %v134_v60 = vpop.f32.mrf.mxu0 }
  0xab   :  { %v262_v1 = vmul.f32 %v978_v62, %v134_v60  ;;  %v448_v60 = vld [vmem:[#allocation5 + $0xe0] sm:$0xff] }
  0xac   :  { %455 = vmatpush.msra.mxu2 %v448_v60 }
  0xb2   :  { %v137_v0 = vpop.f32.mrf.mxu0 }
  0xb3   :  { %v263_v2 = vmul.f32 %v980_v63, %v137_v0  ;;  %v447_v0 = vld [vmem:[#allocation5 + $0xd8] sm:$0xff] }
  0xb4   :  { %456 = vmatpush.msra.mxu2 %v447_v0 }
  0xb5   :  { %v278_v3 = vpack.c.bf16 %v263_v2, %v262_v1  ;;  %v446_v1 = vld [vmem:[#allocation5 + $0xd0] sm:$0xff]  ;;  %v1017_v2 = vld [vmem:[#allocation2 + $0x28] sm:$0xff] }
  0xb6   :  { %457 = vmatpush.msra.mxu2 %v446_v1 }
  0xba   :  { %v140_v5 = vpop.f32.mrf.mxu0 }
  0xbb   :  { %v264_v8 = vmul.f32 %v974_v59, %v140_v5  ;;  %v444_v5 = vld [vmem:[#allocation5 + $0xc0] sm:$0xff] }
  0xc2   :  { %v143_v7 = vpop.f32.mrf.mxu0 }
  0xc3   :  { %v265_v9 = vmul.f32 %v986_v6, %v143_v7  ;;  %v443_v7 = vld [vmem:[#allocation5 + $0xb8] sm:$0xff] }
  0xc5   :  { %v279_v10 = vpack.c.bf16 %v265_v9, %v264_v8  ;;  %v442_v8 = vld [vmem:[#allocation5 + $0xb0] sm:$0xff]  ;;  %v441_v9 = vld [vmem:[#allocation5 + $0xa8] sm:$0xff] }
  0xca   :  { %v146_v11 = vpop.f32.mrf.mxu0 }
  0xcb   :  { %v266_v13 = vmul.f32 %v984_v4, %v146_v11  ;;  %v1020_v11 = vld [vmem:[#allocation2 + $0x30] sm:$0xff] }
  0xd2   :  { %v149_v12 = vpop.f32.mrf.mxu0 }
  0xd3   :  { %v267_v14 = vmul.f32 %v972_v58, %v149_v12  ;;  %v439_v12 = vld [vmem:[#allocation5 + $0x98] sm:$0xff] }
  0xd5   :  { %v280_v15 = vpack.c.bf16 %v267_v14, %v266_v13  ;;  %v438_v13 = vld [vmem:[#allocation5 + $0x90] sm:$0xff]  ;;  %v437_v14 = vld [vmem:[#allocation5 + $0x88] sm:$0xff] }
  0xda   :  { %v152_v16 = vpop.f32.mrf.mxu0 }
  0xdb   :  { %v268_v18 = vmul.f32 %v963_v54, %v152_v16  ;;  %v1023_v16 = vld [vmem:[#allocation2 + $0x38] sm:$0xff] }
  0xe2   :  { %v155_v17 = vpop.f32.mrf.mxu0 }
  0xe3   :  { %v269_v19 = vmul.f32 %v965_v55, %v155_v17  ;;  %v1029_v17 = vld [vmem:[%s1133_s3] ss:$0 sm:$0xff] }
  0xe5   :  { %v281_v20 = vpack.c.bf16 %v269_v19, %v268_v18 }
  0xea   :  { %v158_v21 = vpop.f32.mrf.mxu0 }
  0xeb   :  { %v270_v39 = vmul.f32 %v956_v51, %v158_v21 }
  0xf2   :  { %v161_v22 = vpop.f32.mrf.mxu0 }
  0xf3   :  { %v271_v37 = vmul.f32 %v976_v61, %v161_v22 }
  0xf5   :  { %v282_v40 = vpack.c.bf16 %v271_v37, %v270_v39 }
  0xfa   :  { %v164_v23 = vpop.f32.mrf.mxu0 }
  0xfb   :  { %v272_v36 = vmul.f32 %v944_v46, %v164_v23 }
 0x102   :  { %v167_v24 = vpop.f32.mrf.mxu0 }
 0x103   :  { %v273_v34 = vmul.f32 %v951_v49, %v167_v24 }
 0x105   :  { %v283_v38 = vpack.c.bf16 %v273_v34, %v272_v36 }
 0x10a   :  { %v170_v25 = vpop.f32.mrf.mxu0 }
 0x10b   :  { %v274_v33 = vmul.f32 %v958_v52, %v170_v25 }
 0x112   :  { %v173_v26 = vpop.f32.mrf.mxu0 }
 0x113   :  { %v275_v31 = vmul.f32 %v970_v57, %v173_v26 }
 0x115   :  { %v284_v35 = vpack.c.bf16 %v275_v31, %v274_v33 }
 0x11a   :  { %v176_v27 = vpop.f32.mrf.mxu0 }
 0x11b   :  { %v276_v29 = vmul.f32 %v942_v45, %v176_v27 }
 0x122   :  { %v179_v28 = vpop.f32.mrf.mxu0 }
 0x123   :  { %v277_v30 = vmul.f32 %v949_v48, %v179_v28 }
 0x125   :  { %v285_v32 = vpack.c.bf16 %v277_v30, %v276_v29 }
 0x127   :  { %334 = vmatpush.bf16.msra.mxu1 %v285_v32 }
 0x12b   :  { %335 = vmatpush.bf16.msra.mxu1 %v284_v35 }
 0x12f   :  { %336 = vmatpush.bf16.msra.mxu1 %v283_v38 }
 0x133   :  { %337 = vmatpush.bf16.msra.mxu1 %v282_v40 }
 0x137   :  { %338 = vmatpush.bf16.msra.mxu1 %v281_v20 }
 0x13b   :  { %339 = vmatpush.bf16.msra.mxu1 %v280_v15  ;;  %v436_v15 = vld [vmem:[#allocation5 + $0x80] sm:$0xff] }
 0x13f   :  { %340 = vmatpush.bf16.msra.mxu1 %v279_v10  ;;  %v440_v10 = vld [vmem:[#allocation5 + $0xa0] sm:$0xff] }
 0x143   :  { %341 = vmatpush.bf16.msra.mxu1 %v278_v3  ;;  %v445_v3 = vld [vmem:[#allocation5 + $0xc8] sm:$0xff] }
 0x144   :  { %458 = vmatpush.msra.mxu2 %v445_v3 }
 0x146   :  { %342 = vmatmul.bf16.vlgmr.msra.gmra.mxu1 %v1002_v41  ;;  %459 = vmatpush.msra.mxu2 %v444_v5 }
 0x148   :  { %460 = vmatpush.msra.mxu2 %v443_v7 }
 0x14a   :  { %461 = vmatpush.msra.mxu2 %v442_v8 }
 0x14c   :  { %462 = vmatpush.msra.mxu2 %v441_v9 }
 0x14e   :  { %463 = vmatpush.msra.mxu2 %v440_v10 }
 0x150   :  { %464 = vmatpush.msra.mxu2 %v439_v12 }
 0x152   :  { %465 = vmatpush.msra.mxu2 %v438_v13 }
 0x154   :  { %466 = vmatpush.msra.mxu2 %v437_v14 }
 0x156   :  { %347 = vmatmul.bf16.gmra.mxu1 %v1005_v42  ;;  %467 = vmatpush.msra.mxu2 %v436_v15 }
 0x166   :  { %352 = vmatmul.bf16.gmra.mxu1 %v1008_v43 }
 0x176   :  { %357 = vmatmul.bf16.gmra.mxu1 %v1011_v44 }
 0x186   :  { %362 = vmatmul.bf16.gmra.mxu1 %v1014_v47 }
 0x196   :  { %367 = vmatmul.bf16.gmra.mxu1 %v1017_v2 }
 0x1a6   :  { %372 = vmatmul.bf16.gmra.mxu1 %v1020_v11 }
 0x1b6   :  { %377 = vmatmul.bf16.gmra.mxu1 %v1023_v16 }
 0x1c3   :  { %v343_v18 = vpop.f32.mrf.mxu1 }
 0x1c4   :  { %v383_v19 = vmul.f32 %v343_v18, %v978_v62 }
 0x1c6   :  { %v403_v20 = vadd.f32 %v1029_v17, %v383_v19 }
 0x1c8   :  { %v419_v21 = vmax.f32 %v403_v20, 0.0 }
 0x1ca   :  { %468 = vmatmul.f32.vlgmr.msra.gmra.mxu2 %v419_v21 }
 0x1cb   :  { %v345_v22 = vpop.f32.mrf.mxu1 }
 0x1cc   :  { %v384_v23 = vmul.f32 %v345_v22, %v980_v63 }
 0x1ce   :  { %v404_v24 = vadd.f32 %v1029_v17, %v384_v23 }
 0x1d0   :  { %v420_v25 = vmax.f32 %v404_v24, 0.0 }
 0x1d2   :  { %471 = vmatmul.f32.gmra.mxu2 %v420_v25 }
 0x1d3   :  { %v348_v26 = vpop.f32.mrf.mxu1 }
 0x1d4   :  { %v385_v27 = vmul.f32 %v348_v26, %v974_v59 }
 0x1d6   :  { %v405_v28 = vadd.f32 %v1029_v17, %v385_v27 }
 0x1d8   :  { %v421_v29 = vmax.f32 %v405_v28, 0.0 }
 0x1da   :  { %474 = vmatmul.f32.gmra.mxu2 %v421_v29 }
 0x1db   :  { %v350_v30 = vpop.f32.mrf.mxu1 }
 0x1dc   :  { %v386_v31 = vmul.f32 %v350_v30, %v986_v6 }
 0x1de   :  { %v406_v32 = vadd.f32 %v1029_v17, %v386_v31 }
 0x1e0   :  { %v422_v33 = vmax.f32 %v406_v32, 0.0 }
 0x1e2   :  { %477 = vmatmul.f32.gmra.mxu2 %v422_v33 }
 0x1e3   :  { %v353_v34 = vpop.f32.mrf.mxu1 }
 0x1e4   :  { %v387_v35 = vmul.f32 %v353_v34, %v984_v4 }
 0x1e6   :  { %v407_v36 = vadd.f32 %v1029_v17, %v387_v35 }
 0x1e8   :  { %v423_v37 = vmax.f32 %v407_v36, 0.0 }
 0x1ea   :  { %480 = vmatmul.f32.gmra.mxu2 %v423_v37 }
 0x1eb   :  { %v355_v38 = vpop.f32.mrf.mxu1 }
 0x1ec   :  { %v388_v39 = vmul.f32 %v355_v38, %v972_v58 }
 0x1ee   :  { %v408_v40 = vadd.f32 %v1029_v17, %v388_v39 }
 0x1f0   :  { %v424_v50 = vmax.f32 %v408_v40, 0.0 }
 0x1f2   :  { %483 = vmatmul.f32.gmra.mxu2 %v424_v50 }
 0x1f3   :  { %v358_v53 = vpop.f32.mrf.mxu1 }
 0x1f4   :  { %v389_v56 = vmul.f32 %v358_v53, %v963_v54 }
 0x1f6   :  { %v409_v60 = vadd.f32 %v1029_v17, %v389_v56 }
 0x1f8   :  { %v425_v0 = vmax.f32 %v409_v60, 0.0 }
 0x1fa   :  { %486 = vmatmul.f32.gmra.mxu2 %v425_v0 }
 0x1fb   :  { %v360_v1 = vpop.f32.mrf.mxu1 }
 0x1fc   :  { %v390_v3 = vmul.f32 %v360_v1, %v965_v55 }
 0x1fe   :  { %v410_v5 = vadd.f32 %v1029_v17, %v390_v3 }
 0x200   :  { %v426_v7 = vmax.f32 %v410_v5, 0.0 }
 0x202   :  { %489 = vmatmul.f32.gmra.mxu2 %v426_v7 }
 0x203   :  { %v363_v8 = vpop.f32.mrf.mxu1 }
 0x204   :  { %v391_v9 = vmul.f32 %v363_v8, %v956_v51 }
 0x206   :  { %v411_v10 = vadd.f32 %v1029_v17, %v391_v9 }
 0x208   :  { %v427_v12 = vmax.f32 %v411_v10, 0.0 }
 0x20a   :  { %492 = vmatmul.f32.gmra.mxu2 %v427_v12 }
 0x20b   :  { %v365_v13 = vpop.f32.mrf.mxu1 }
 0x20c   :  { %v392_v14 = vmul.f32 %v365_v13, %v976_v61 }
 0x20e   :  { %v412_v15 = vadd.f32 %v1029_v17, %v392_v14 }
 0x210   :  { %v428_v18 = vmax.f32 %v412_v15, 0.0 }
 0x212   :  { %495 = vmatmul.f32.gmra.mxu2 %v428_v18 }
 0x213   :  { %v368_v19 = vpop.f32.mrf.mxu1 }
 0x214   :  { %v393_v20 = vmul.f32 %v368_v19, %v944_v46 }
 0x216   :  { %v413_v21 = vadd.f32 %v1029_v17, %v393_v20 }
 0x218   :  { %v429_v22 = vmax.f32 %v413_v21, 0.0 }
 0x21a   :  { %498 = vmatmul.f32.gmra.mxu2 %v429_v22 }
 0x21b   :  { %v370_v23 = vpop.f32.mrf.mxu1 }
 0x21c   :  { %v394_v24 = vmul.f32 %v370_v23, %v951_v49 }
 0x21e   :  { %v414_v25 = vadd.f32 %v1029_v17, %v394_v24 }
 0x220   :  { %v430_v26 = vmax.f32 %v414_v25, 0.0 }
 0x222   :  { %501 = vmatmul.f32.gmra.mxu2 %v430_v26 }
 0x223   :  { %v373_v27 = vpop.f32.mrf.mxu1 }
 0x224   :  { %v395_v28 = vmul.f32 %v373_v27, %v958_v52 }
 0x226   :  { %v415_v29 = vadd.f32 %v1029_v17, %v395_v28 }
 0x228   :  { %v431_v30 = vmax.f32 %v415_v29, 0.0 }
 0x22a   :  { %504 = vmatmul.f32.gmra.mxu2 %v431_v30 }
 0x22b   :  { %v375_v31 = vpop.f32.mrf.mxu1 }
 0x22c   :  { %v396_v32 = vmul.f32 %v375_v31, %v970_v57 }
 0x22e   :  { %v416_v33 = vadd.f32 %v1029_v17, %v396_v32 }
 0x230   :  { %v432_v34 = vmax.f32 %v416_v33, 0.0 }
 0x232   :  { %507 = vmatmul.f32.gmra.mxu2 %v432_v34 }
 0x233   :  { %v378_v35 = vpop.f32.mrf.mxu1 }
 0x234   :  { %v397_v36 = vmul.f32 %v378_v35, %v942_v45 }
 0x236   :  { %v417_v37 = vadd.f32 %v1029_v17, %v397_v36 }
 0x238   :  { %v433_v38 = vmax.f32 %v417_v37, 0.0 }
 0x23a   :  { %510 = vmatmul.f32.gmra.mxu2 %v433_v38 }
 0x23b   :  { %v380_v39 = vpop.f32.mrf.mxu1 }
 0x23c   :  { %v398_v40 = vmul.f32 %v380_v39, %v949_v48 }
 0x23e   :  { %v418_v50 = vadd.f32 %v1029_v17, %v398_v40 }
 0x240   :  { %v434_v53 = vmax.f32 %v418_v50, 0.0 }
 0x242   :  { %513 = vmatmul.f32.gmra.mxu2 %v434_v53 }
 0x24d   :  { %v469_v56 = vpop.f32.mrf.mxu2 }
 0x24e   :  { %v517_v0 = vmul.f32 %v469_v56, %v978_v62  ;;  %v1090_v56 = vld [vmem:[%s1133_s3 + $0x1] ss:$0 sm:$0xff]  ;;  %s818_s3 = smov [#allocation7]  }
 0x24f   :  { %s663_s21 = sshll.u32 %s818_s3, 4  ;;  %s664_s21 = int_to_ptr.vmem [resolvable:$true] %s663_s21 }
 0x255   :  { %v472_v60 = vpop.f32.mrf.mxu2 }
 0x256   :  { %v518_v1 = vmul.f32 %v472_v60, %v980_v63 }
 0x258   :  { %v533_v3 = vpack.c.bf16 %v518_v1, %v517_v0 }
 0x25d   :  { %v475_v5 = vpop.f32.mrf.mxu2 }
 0x25e   :  { %v519_v8 = vmul.f32 %v475_v5, %v974_v59 }
 0x265   :  { %v478_v7 = vpop.f32.mrf.mxu2 }
 0x266   :  { %v520_v9 = vmul.f32 %v478_v7, %v986_v6 }
 0x268   :  { %v534_v10 = vpack.c.bf16 %v520_v9, %v519_v8 }
 0x26d   :  { %v481_v12 = vpop.f32.mrf.mxu2 }
 0x26e   :  { %v521_v17 = vmul.f32 %v481_v12, %v984_v4 }
 0x275   :  { %v484_v13 = vpop.f32.mrf.mxu2 }
 0x276   :  { %v522_v14 = vmul.f32 %v484_v13, %v972_v58 }
 0x278   :  { %v535_v15 = vpack.c.bf16 %v522_v14, %v521_v17 }
 0x27d   :  { %v487_v18 = vpop.f32.mrf.mxu2 }
 0x27e   :  { %v523_v20 = vmul.f32 %v487_v18, %v963_v54 }
 0x285   :  { %v490_v19 = vpop.f32.mrf.mxu2 }
 0x286   :  { %v524_v21 = vmul.f32 %v490_v19, %v965_v55 }
 0x288   :  { %v536_v22 = vpack.c.bf16 %v524_v21, %v523_v20 }
 0x28d   :  { %v493_v23 = vpop.f32.mrf.mxu2 }
 0x28e   :  { %v525_v50 = vmul.f32 %v493_v23, %v956_v51 }
 0x295   :  { %v496_v24 = vpop.f32.mrf.mxu2 }
 0x296   :  { %v526_v39 = vmul.f32 %v496_v24, %v976_v61 }
 0x298   :  { %v537_v53 = vpack.c.bf16 %v526_v39, %v525_v50 }
 0x29d   :  { %v499_v25 = vpop.f32.mrf.mxu2 }
 0x29e   :  { %v527_v38 = vmul.f32 %v499_v25, %v944_v46 }
 0x2a5   :  { %v502_v26 = vpop.f32.mrf.mxu2 }
 0x2a6   :  { %v528_v36 = vmul.f32 %v502_v26, %v951_v49 }
 0x2a8   :  { %v538_v40 = vpack.c.bf16 %v528_v36, %v527_v38 }
 0x2ad   :  { %v505_v27 = vpop.f32.mrf.mxu2 }
 0x2ae   :  { %v529_v35 = vmul.f32 %v505_v27, %v958_v52 }
 0x2b5   :  { %v508_v28 = vpop.f32.mrf.mxu2 }
 0x2b6   :  { %v530_v33 = vmul.f32 %v508_v28, %v970_v57 }
 0x2b8   :  { %v539_v37 = vpack.c.bf16 %v530_v33, %v529_v35 }
 0x2bd   :  { %v511_v29 = vpop.f32.mrf.mxu2 }
 0x2be   :  { %v531_v31 = vmul.f32 %v511_v29, %v942_v45 }
 0x2c5   :  { %v514_v30 = vpop.f32.mrf.mxu2 }
 0x2c6   :  { %v532_v32 = vmul.f32 %v514_v30, %v949_v48 }
 0x2c8   :  { %v540_v34 = vpack.c.bf16 %v532_v32, %v531_v31 }
 0x2ca   :  { %541 = vmatpush.bf16.msra.mxu3 %v540_v34 }
 0x2ce   :  { %542 = vmatpush.bf16.msra.mxu3 %v539_v37 }
 0x2d2   :  { %543 = vmatpush.bf16.msra.mxu3 %v538_v40 }
 0x2d6   :  { %544 = vmatpush.bf16.msra.mxu3 %v537_v53 }
 0x2da   :  { %545 = vmatpush.bf16.msra.mxu3 %v536_v22 }
 0x2de   :  { %546 = vmatpush.bf16.msra.mxu3 %v535_v15 }
 0x2e2   :  { %547 = vmatpush.bf16.msra.mxu3 %v534_v10 }
 0x2e6   :  { %548 = vmatpush.bf16.msra.mxu3 %v533_v3 }
 0x2e9   :  { %549 = vmatmul.bf16.vlgmr.msra.gmra.mxu3 %v1002_v41 }
 0x2f9   :  { %554 = vmatmul.bf16.gmra.mxu3 %v1005_v42 }
 0x309   :  { %559 = vmatmul.bf16.gmra.mxu3 %v1008_v43 }
 0x319   :  { %564 = vmatmul.bf16.gmra.mxu3 %v1011_v44 }
 0x329   :  { %569 = vmatmul.bf16.gmra.mxu3 %v1014_v47 }
 0x339   :  { %574 = vmatmul.bf16.gmra.mxu3 %v1017_v2 }
 0x349   :  { %579 = vmatmul.bf16.gmra.mxu3 %v1020_v11 }
 0x359   :  { %584 = vmatmul.bf16.gmra.mxu3 %v1023_v16 }
 0x36c   :  { %v550_v41 = vpop.f32.mrf.mxu3 }
 0x36d   :  { %v590_v42 = vmul.f32 %v550_v41, %v978_v62 }
 0x36f   :  { %v611_v43 = vadd.f32 %v1090_v56, %v590_v42 }
 0x371   :  { %v627_v60 = vmax.f32 %v611_v43, 0.0 }
 0x373   :  { %643 = vst [vmem:[#allocation7] sm:$0xff] %v627_v60 }
 0x374   :  { %v552_v44 = vpop.f32.mrf.mxu3 }
 0x375   :  { %v591_v47 = vmul.f32 %v552_v44, %v980_v63 }
 0x377   :  { %v612_v2 = vadd.f32 %v1090_v56, %v591_v47 }
 0x379   :  { %v628_v11 = vmax.f32 %v612_v2, 0.0 }
 0x37b   :  { %644 = vst [vmem:[#allocation7 + $0x8] sm:$0xff] %v628_v11 }
 0x37c   :  { %v555_v16 = vpop.f32.mrf.mxu3 }
 0x37d   :  { %v592_v0 = vmul.f32 %v555_v16, %v974_v59 }
 0x37f   :  { %v613_v1 = vadd.f32 %v1090_v56, %v592_v0 }
 0x381   :  { %v629_v3 = vmax.f32 %v613_v1, 0.0 }
 0x383   :  { %645 = vst [vmem:[#allocation7 + $0x10] sm:$0xff] %v629_v3 }
 0x384   :  { %v557_v5 = vpop.f32.mrf.mxu3 }
 0x385   :  { %v593_v62 = vmul.f32 %v557_v5, %v986_v6 }
 0x387   :  { %v614_v7 = vadd.f32 %v1090_v56, %v593_v62 }
 0x389   :  { %v630_v8 = vmax.f32 %v614_v7, 0.0 }
 0x38b   :  { %646 = vst [vmem:[#allocation7 + $0x18] sm:$0xff] %v630_v8 }
 0x38c   :  { %v560_v9 = vpop.f32.mrf.mxu3 }
 0x38d   :  { %v594_v63 = vmul.f32 %v560_v9, %v984_v4 }
 0x38f   :  { %v615_v10 = vadd.f32 %v1090_v56, %v594_v63 }
 0x391   :  { %v631_v12 = vmax.f32 %v615_v10, 0.0 }
 0x393   :  { %647 = vst [vmem:[#allocation7 + $0x20] sm:$0xff] %v631_v12 }
 0x394   :  { %v562_v13 = vpop.f32.mrf.mxu3 }
 0x395   :  { %v595_v59 = vmul.f32 %v562_v13, %v972_v58 }
 0x397   :  { %v616_v17 = vadd.f32 %v1090_v56, %v595_v59 }
 0x399   :  { %v632_v14 = vmax.f32 %v616_v17, 0.0 }
 0x39b   :  { %648 = vst [vmem:[#allocation7 + $0x28] sm:$0xff] %v632_v14 }
 0x39c   :  { %v565_v15 = vpop.f32.mrf.mxu3 }
 0x39d   :  { %v596_v6 = vmul.f32 %v565_v15, %v963_v54 }
 0x39f   :  { %v617_v18 = vadd.f32 %v1090_v56, %v596_v6 }
 0x3a1   :  { %v633_v19 = vmax.f32 %v617_v18, 0.0 }
 0x3a3   :  { %649 = vst [vmem:[#allocation7 + $0x30] sm:$0xff] %v633_v19 }
 0x3a4   :  { %v567_v20 = vpop.f32.mrf.mxu3 }
 0x3a5   :  { %v597_v4 = vmul.f32 %v567_v20, %v965_v55 }
 0x3a7   :  { %v618_v21 = vadd.f32 %v1090_v56, %v597_v4 }
 0x3a9   :  { %v634_v22 = vmax.f32 %v618_v21, 0.0 }
 0x3ab   :  { %650 = vst [vmem:[#allocation7 + $0x38] sm:$0xff] %v634_v22 }
 0x3ac   :  { %v570_v23 = vpop.f32.mrf.mxu3 }
 0x3ad   :  { %v598_v58 = vmul.f32 %v570_v23, %v956_v51 }
 0x3af   :  { %v619_v24 = vadd.f32 %v1090_v56, %v598_v58 }
 0x3b1   :  { %v635_v25 = vmax.f32 %v619_v24, 0.0 }
 0x3b3   :  { %651 = vst [vmem:[#allocation7 + $0x40] sm:$0xff] %v635_v25 }
 0x3b4   :  { %v572_v26 = vpop.f32.mrf.mxu3 }
 0x3b5   :  { %v599_v54 = vmul.f32 %v572_v26, %v976_v61 }
 0x3b7   :  { %v620_v27 = vadd.f32 %v1090_v56, %v599_v54 }
 0x3b9   :  { %v636_v28 = vmax.f32 %v620_v27, 0.0 }
 0x3bb   :  { %652 = vst [vmem:[#allocation7 + $0x48] sm:$0xff] %v636_v28 }
 0x3bc   :  { %v575_v29 = vpop.f32.mrf.mxu3 }
 0x3bd   :  { %v600_v55 = vmul.f32 %v575_v29, %v944_v46 }
 0x3bf   :  { %v621_v30 = vadd.f32 %v1090_v56, %v600_v55 }
 0x3c1   :  { %v637_v31 = vmax.f32 %v621_v30, 0.0 }
 0x3c3   :  { %653 = vst [vmem:[#allocation7 + $0x50] sm:$0xff] %v637_v31 }
 0x3c4   :  { %v577_v32 = vpop.f32.mrf.mxu3 }
 0x3c5   :  { %v601_v51 = vmul.f32 %v577_v32, %v951_v49 }
 0x3c7   :  { %v622_v33 = vadd.f32 %v1090_v56, %v601_v51 }
 0x3c9   :  { %v638_v34 = vmax.f32 %v622_v33, 0.0 }
 0x3cb   :  { %654 = vst [vmem:[#allocation7 + $0x58] sm:$0xff] %v638_v34 }
 0x3cc   :  { %v580_v35 = vpop.f32.mrf.mxu3 }
 0x3cd   :  { %v602_v61 = vmul.f32 %v580_v35, %v958_v52 }
 0x3cf   :  { %v623_v36 = vadd.f32 %v1090_v56, %v602_v61 }
 0x3d1   :  { %v639_v37 = vmax.f32 %v623_v36, 0.0 }
 0x3d3   :  { %655 = vst [vmem:[#allocation7 + $0x60] sm:$0xff] %v639_v37 }
 0x3d4   :  { %v582_v38 = vpop.f32.mrf.mxu3 }
 0x3d5   :  { %v603_v46 = vmul.f32 %v582_v38, %v970_v57 }
 0x3d7   :  { %v624_v39 = vadd.f32 %v1090_v56, %v603_v46 }
 0x3d9   :  { %v640_v40 = vmax.f32 %v624_v39, 0.0 }
 0x3db   :  { %656 = vst [vmem:[#allocation7 + $0x68] sm:$0xff] %v640_v40 }
 0x3dc   :  { %v585_v50 = vpop.f32.mrf.mxu3 }
 0x3dd   :  { %v604_v49 = vmul.f32 %v585_v50, %v942_v45 }
 0x3df   :  { %v625_v53 = vadd.f32 %v1090_v56, %v604_v49 }
 0x3e1   :  { %v641_v41 = vmax.f32 %v625_v53, 0.0 }
 0x3e3   :  { %657 = vst [vmem:[#allocation7 + $0x70] sm:$0xff] %v641_v41 }
 0x3e4   :  { %v587_v42 = vpop.f32.mrf.mxu3 }
 0x3e5   :  { %v605_v52 = vmul.f32 %v587_v42, %v949_v48 }
 0x3e7   :  { %v626_v57 = vadd.f32 %v1090_v56, %v605_v52 }
 0x3e9   :  { %v642_v43 = vmax.f32 %v626_v57, 0.0 }
 0x3eb   :  { %658 = vst [vmem:[#allocation7 + $0x78] sm:$0xff] %v642_v43 }
 0x3ec   :  { %671 = dma.vmem_to_hbm [thread:$0]  %s664_s21, 2048, %s666_s4, [#allocation4], %s815_s30, %s815_s30, %s816_s6  }
 0x3ed   :  { %809 = dma.done.wait [#allocation4], 2048  }
 0x3ee   :  { %810 = vsyncadd [#allocation4], 4294965248 }
 0x3ef   :  { %676 = vsyncpa [#allocation3], 1 }
 0x3f0   :  { %677 = vsyncpa [#allocation6], 1 }
 0x3f1   :  { %678 = vsyncpa [#allocation4], 1 }

</bundles_post_ra>
